<compile_context>
chip_gen: v7x
topology: tpu7x:2x2x1
jax: 0.10.0
libtpu: 0.0.40
codegen_flags: <defaults>
</compile_context>

<pallas_src>
import jax
import jax.numpy as jnp
from jax.experimental import pallas as pl
from jax.experimental.pallas import tpu as pltpu

_BF16 = jnp.bfloat16
_F32 = jnp.float32


# ---------------------------------------------------------------------------
# Small static helpers (Python ints only).
# ---------------------------------------------------------------------------
def _cdiv(a, b):
    return (a + b - 1) // b


def _padded_bytes(shape, itemsize):
    """Rough VMEM footprint of one buffer (last two dims padded to (8,128))."""
    dims = list(shape) if shape else [1]
    dims[-1] = _cdiv(dims[-1], 128) * 128
    if len(dims) >= 2:
        dims[-2] = _cdiv(dims[-2], 8) * 8
    n = 1
    for d in dims:
        n *= int(d)
    return n * itemsize


def _scoped_vmem_cap():
    """Generation-aware scoped-VMEM cap (headroom below physical VMEM)."""
    phys = 64 << 20                      # conservative (v7x-sized) fallback
    try:
        info = pltpu.get_tpu_info()
        phys = int(getattr(info, "vmem_capacity_bytes", phys))
    except Exception:
        pass
    if phys <= (64 << 20):               # v7x: 64 MiB physical -> cap ~48 MiB
        return 48 << 20
    return 96 << 20                      # v5e/v6e: 128 MiB physical -> ~96 MiB


def _choose_vocab_tile(H4, V, scoped_cap):
    """Vocab tile so the double-buffered bf16 weight tile uses ~50% of the cap."""
    weight_budget = scoped_cap // 2
    tv = (weight_budget // (2 * H4 * 2)) // 128 * 128
    tv = max(128, min(tv, 4096))
    tv = min(tv, _cdiv(V, 128) * 128)
    n = _cdiv(V, tv)
    # v7x megacore: prefer an even tile count >= 2 (best effort; neutral on 1-TC chips).
    if n > 1 and n % 2 == 1:
        tv2 = max(128, _cdiv(_cdiv(V, n + 1), 128) * 128)
        if _cdiv(V, tv2) % 2 == 0:
            tv = tv2
    v_pad = _cdiv(V, tv) * tv
    return tv, v_pad


# ---------------------------------------------------------------------------
# One-time weight preparation (hoisted out of the per-step forward).
# ---------------------------------------------------------------------------
def prepare_decoder_params(params, *, n_layers, emb_dim, hid_dim):
    H2 = 2 * hid_dim
    H4 = 4 * H2
    V = params["w3T"].shape[1]
    scoped_cap = _scoped_vmem_cap()
    TV, V_pad = _choose_vocab_tile(H4, V, scoped_cap)

    # Pre-pad + pre-cast the dominant vocab projection weights (done once).
    w3 = params["w3T"].astype(_BF16)
    b3 = params["b3"].astype(_F32)
    if V_pad != V:
        w3 = jnp.pad(w3, ((0, 0), (0, V_pad - V)))
        b3 = jnp.pad(b3, ((0, 0), (0, V_pad - V)))

    # Pack each GRU layer into one [in_l+H2, 4*H2] weight so the kernel does a
    # single dot per layer; columns = [Wr(x)+Wr(h) | Wz(x)+Wz(h) | Wn(x) | Wn(h)]
    # (the n-gate needs gi_n and gh_n separately because of r * gh_n).
    gru_packed = []
    for l in range(n_layers):
        g = params["gru"][l]
        wih, whh = g["wihT"], g["whhT"]            # [in_l,3H2], [H2,3H2]
        bih, bhh = g["bih"], g["bhh"]              # [1,3H2]
        in_l = wih.shape[0]
        top = jnp.concatenate(
            [wih[:, :2 * H2], wih[:, 2 * H2:], jnp.zeros((in_l, H2), wih.dtype)],
            axis=1)
        bot = jnp.concatenate(
            [whh[:, :2 * H2], jnp.zeros((H2, H2), whh.dtype), whh[:, 2 * H2:]],
            axis=1)
        w_cat = jnp.concatenate([top, bot], axis=0).astype(_BF16)   # [in_l+H2,4H2]
        b_cat = jnp.concatenate(
            [bih[:, :2 * H2] + bhh[:, :2 * H2], bih[:, 2 * H2:], bhh[:, 2 * H2:]],
            axis=1).astype(_F32)                                    # [1,4H2]
        gru_packed.append((w_cat, b_cat))

    return {
        "n_layers": n_layers, "emb_dim": emb_dim,
        "H2": H2, "H4": H4, "V": V, "V_pad": V_pad, "TV": TV,
        "scoped_cap": scoped_cap,
        "embedding": params["embedding"],                    # f32 gather table
        "attn_w_encT": params["attn_wT"][:H2, :].astype(_BF16),
        "attn_w_decT": params["attn_wT"][H2:, :].astype(_BF16),
        "attn_b": params["attn_b"].astype(_F32),
        "v_row": params["v_w"].T.astype(_F32),               # [1,H2] for VPU reduce
        "gru": gru_packed,
        "w1T": params["w1T"].astype(_BF16), "b1": params["b1"].astype(_F32),
        "w2T": params["w2T"].astype(_BF16), "b2": params["b2"].astype(_F32),
        "w3T_pad": w3, "b3_pad": b3,
    }


# ---------------------------------------------------------------------------
# Kernel 1: attention + GRU stack + first two output-MLP layers.
# ---------------------------------------------------------------------------
def _make_core_kernel(n_layers, emb_dim):
    def kernel(*refs):
        (emb_ref, hid_ref, enc_ref, wenc_ref, wdec_ref, attn_b_ref, v_ref) = refs[:7]
        idx = 7
        gru_refs = refs[idx:idx + 2 * n_layers]
        idx += 2 * n_layers
        w1_ref, b1_ref, w2_ref, b2_ref = refs[idx:idx + 4]
        o2_ref, newh_ref = refs[idx + 4:]

        B, S, H2 = enc_ref.shape

        # ---------------- additive attention ----------------
        enc = enc_ref[...]                       # bf16 [B,S,H2]
        dec_h = hid_ref[n_layers - 1]            # f32  [B,H2]   (hidden[-1])

        # concat(enc, dec_h) @ W == enc @ W_enc + dec_h @ W_dec (no concat/repeat).
        e_enc = jnp.dot(enc.reshape(B * S, H2), wenc_ref[...],
                        preferred_element_type=_F32).reshape(B, S, H2)
        e_dec = jnp.dot(dec_h.astype(_BF16), wdec_ref[...],
                        preferred_element_type=_F32)
        energy = jnp.tanh(e_enc + e_dec[:, None, :] + attn_b_ref[...][None, :, :])

        # Score: VPU multiply + lane reduce (a 1-wide MXU matvec wastes lanes).
        score = jnp.sum(energy * v_ref[...][None, :, :], axis=-1)           # [B,S]
        score = score - jnp.max(score, axis=1, keepdims=True)
        expw = jnp.exp(score)
        inv = pl.reciprocal(jnp.sum(expw, axis=1, keepdims=True), approx=True)
        attn = expw * inv                                                   # softmax(S)

        # Context: VPU multiply + sublane reduce (avoids B degenerate M=1 MXU matmuls).
        context = jnp.sum(attn[:, :, None] * enc.astype(_F32), axis=1)      # [B,H2]

        # ---------------- GRU stack (single time step) ----------------
        embedded = emb_ref[...]                                             # f32 [B,E]
        x = None
        for layer in range(n_layers):
            w_cat = gru_refs[2 * layer][...]      # bf16 [in_l+H2, 4*H2] (packed)
            b_cat = gru_refs[2 * layer + 1][...]  # f32  [1,       4*H2]
            h_prev = hid_ref[layer]               # f32  [B,H2]

            if layer == 0:
                x_in = jnp.concatenate(
                    [embedded.astype(_BF16), context.astype(_BF16)], axis=-1)
            else:
                x_in = x.astype(_BF16)
            xh = jnp.concatenate([x_in, h_prev.astype(_BF16)], axis=-1)

            # One packed dot: [gi_r+gh_r | gi_z+gh_z | gi_n | gh_n].
            g = jnp.dot(xh, w_cat, preferred_element_type=_F32) + b_cat

            # Gate math stays in f32 (v5e has no bf16 VPU/EUP).
            r = jax.nn.sigmoid(g[:, 0:H2])
            z = jax.nn.sigmoid(g[:, H2:2 * H2])
            n = jnp.tanh(g[:, 2 * H2:3 * H2] + r * g[:, 3 * H2:4 * H2])
            h_new = (1.0 - z) * n + z * h_prev

            newh_ref[layer] = h_new
            x = h_new             # inter-layer dropout == identity (eval mode)

        # ---------------- embedding2vocab 1 & 2 ----------------
        o1 = jnp.dot(x.astype(_BF16), w1_ref[...],
                     preferred_element_type=_F32) + b1_ref[...]
        o2 = jnp.dot(o1.astype(_BF16), w2_ref[...],
                     preferred_element_type=_F32) + b2_ref[...]
        o2_ref[...] = o2.astype(o2_ref.dtype)

    return kernel


# ---------------------------------------------------------------------------
# Kernel 2: vocab projection, streamed over lane-dense vocab tiles.
# ---------------------------------------------------------------------------
def _vocab_proj_kernel(o2_ref, w3_ref, b3_ref, pred_ref):
    pred_ref[...] = (jnp.dot(o2_ref[...], w3_ref[...],
                             preferred_element_type=jnp.float32)
                     + b3_ref[...])


# ---------------------------------------------------------------------------
# Per-step forward (prediction [B, vocab], new_hidden [L, B, 2*hid]).
# ---------------------------------------------------------------------------
def decoder_forward(prep, tokens, hidden, encoder_outputs):
    """NOTE: `hidden` is donated into new_hidden (input_output_aliases); the
    caller must not reuse the `hidden` array after this call."""
    n_layers, emb_dim = prep["n_layers"], prep["emb_dim"]
    B = tokens.shape[0]
    L, _, H2 = hidden.shape
    H4 = prep["H4"]
    V, V_pad, TV = prep["V"], prep["V_pad"], prep["TV"]
    scoped_cap = prep["scoped_cap"]

    embedded = prep["embedding"][tokens]             # [B,E] gather
    # TODO(synk): embedding gather stays in plain JAX (data-dependent DMA gather).

    enc = encoder_outputs
    if enc.dtype != _BF16:
        enc = enc.astype(_BF16)   # constant per sentence; callers may pre-cast once.

    inputs = [embedded, hidden, enc,
              prep["attn_w_encT"], prep["attn_w_decT"], prep["attn_b"], prep["v_row"]]
    for w_cat, b_cat in prep["gru"]:
        inputs += [w_cat, b_cat]
    inputs += [prep["w1T"], prep["b1"], prep["w2T"], prep["b2"]]

    # ---- kernel 1: explicit VMEM budget from the resident refs ----
    resident = sum(_padded_bytes(a.shape, a.dtype.itemsize) for a in inputs)
    resident += _padded_bytes((B, H4), 2) + _padded_bytes((L, B, H2), 4)
    vmem1 = int(min(max(16 << 20, resident * 3 // 2 + (4 << 20)), scoped_cap))
    # TODO(synk): at production H2 (>=1024, several layers) the resident GRU/w2
    # weights can exceed the v7x scoped-VMEM cap; stream them over their
    # output-N axis (pltpu.emit_pipeline) instead of holding them resident.

    vmem = pl.BlockSpec(memory_space=pltpu.MemorySpace.VMEM)
    o2, new_hidden = pl.pallas_call(
        _make_core_kernel(n_layers, emb_dim),
        out_shape=(jax.ShapeDtypeStruct((B, H4), _BF16),
                   jax.ShapeDtypeStruct((L, B, H2), _F32)),
        in_specs=[vmem] * len(inputs),
        out_specs=(vmem, vmem),
        # hidden (input 1) aliased to new_hidden (output 1): no extra HBM
        # buffer / writeback per decode step.  Safe: the kernel reads layer l's
        # hidden from its own input window before writing the output window.
        input_output_aliases={1: 1},
        compiler_params=pltpu.CompilerParams(vmem_limit_bytes=vmem1),
    )(*inputs)

    # ---- kernel 2: vocab projection over a lane-dense padded vocab grid ----
    n_tiles = V_pad // TV
    w3, b3 = prep["w3T_pad"], prep["b3_pad"]

    # Exact double-buffered budget: 2x (w3 tile + b3 tile + pred tile + o2) + headroom.
    tile_bytes = (_padded_bytes((H4, TV), 2) + _padded_bytes((1, TV), 4)
                  + _padded_bytes((B, TV), 4) + _padded_bytes((B, H4), 2))
    vmem2 = int(min(max(16 << 20, 2 * tile_bytes + (2 << 20)), scoped_cap))

    pred_pad = pl.pallas_call(
        _vocab_proj_kernel,
        out_shape=jax.ShapeDtypeStruct((B, V_pad), _F32),
        grid=(n_tiles,),
        in_specs=[pl.BlockSpec((B, H4), lambda j: (0, 0)),     # resident activations
                  pl.BlockSpec((H4, TV), lambda j: (0, j)),    # streamed weight tile
                  pl.BlockSpec((1, TV), lambda j: (0, j))],
        out_specs=pl.BlockSpec((B, TV), lambda j: (0, j)),     # lane-dense output
        compiler_params=pltpu.CompilerParams(
            dimension_semantics=("parallel",),                 # v7x megacore
            vmem_limit_bytes=vmem2),
    )(o2, w3, b3)

    pred = pred_pad[:, :V]      # drop padded logits before any downstream argmax
    return pred, new_hidden


# ---------------- pure-JAX reference (mirrors the PyTorch forward) ----------------
def decoder_ref(params, tokens, hidden, encoder_outputs, *, n_layers):
    emb = params["embedding"][tokens]                              # [B, E]
    S = encoder_outputs.shape[1]
    dec_h = hidden[-1]                                             # [B, H2]
    cat = jnp.concatenate(
        [encoder_outputs, jnp.repeat(dec_h[:, None, :], S, axis=1)], axis=-1)
    energy = jnp.tanh(cat @ params["attn_wT"] + params["attn_b"])
    score = jnp.squeeze(energy @ params["v_w"], -1)
    attn = jax.nn.softmax(score, axis=1)
    context = jnp.einsum("bsd,bs->bd", encoder_outputs, attn)
    x = jnp.concatenate([emb, context], axis=-1)
    new_h = []
    for l in range(n_layers):
        g = params["gru"][l]
        h = hidden[l]
        H2 = h.shape[-1]
        gi = x @ g["wihT"] + g["bih"]
        gh = h @ g["whhT"] + g["bhh"]
        r = jax.nn.sigmoid(gi[:, :H2] + gh[:, :H2])
        z = jax.nn.sigmoid(gi[:, H2:2 * H2] + gh[:, H2:2 * H2])
        n = jnp.tanh(gi[:, 2 * H2:] + r * gh[:, 2 * H2:])
        hn = (1.0 - z) * n + z * h
        new_h.append(hn)
        x = hn
    o1 = x @ params["w1T"] + params["b1"]
    o2 = o1 @ params["w2T"] + params["b2"]
    pred = o2 @ params["w3T"] + params["b3"]
    return pred, jnp.stack(new_h)


def init_params(key, *, vocab, emb_dim, hid_dim, n_layers):
    H2 = hid_dim * 2
    in0 = emb_dim + H2            # isatt=True input size for GRU layer 0
    keys = iter(jax.random.split(key, 64))

    def rnd(shape, scale=0.1):
        return (scale * jax.random.normal(next(keys), shape)).astype(jnp.float32)

    params = {
        "embedding": rnd((vocab, emb_dim)),
        # Attention: attn = Linear(4*hid -> 2*hid), v = Linear(2*hid -> 1, no bias)
        "attn_wT": rnd((2 * H2, H2)),
        "attn_b": rnd((1, H2)),
        "v_w": rnd((H2, 1)),
        "gru": [],
        # embedding2vocab1/2/3
        "w1T": rnd((H2, 2 * H2)), "b1": rnd((1, 2 * H2)),
        "w2T": rnd((2 * H2, 4 * H2)), "b2": rnd((1, 4 * H2)),
        "w3T": rnd((4 * H2, vocab)), "b3": rnd((1, vocab)),
    }
    for l in range(n_layers):
        in_l = in0 if l == 0 else H2
        params["gru"].append({
            "wihT": rnd((in_l, 3 * H2)),
            "whhT": rnd((H2, 3 * H2)),
            "bih": rnd((1, 3 * H2)),
            "bhh": rnd((1, 3 * H2)),
        })
    return params


if __name__ == "__main__":
    # Small shapes consistent with the module.
    VOCAB, EMB, HID, LAYERS = 64, 16, 16, 2
    B, S = 2, 8
    H2 = HID * 2

    key = jax.random.PRNGKey(0)
    kp, kt, kh, ke = jax.random.split(key, 4)

    params = init_params(kp, vocab=VOCAB, emb_dim=EMB, hid_dim=HID, n_layers=LAYERS)
    tokens = jax.random.randint(kt, (B,), 0, VOCAB)                       # token ids
    hidden = (0.1 * jax.random.normal(kh, (LAYERS, B, H2))).astype(jnp.float32)
    encoder_outputs = (0.1 * jax.random.normal(ke, (B, S, H2))).astype(jnp.float32)

    # One-time weight preprocessing (would be done once per model, not per token).
    prep = prepare_decoder_params(params, n_layers=LAYERS, emb_dim=EMB, hid_dim=HID)

    # Compute the reference first (the kernel donates `hidden` into its output).
    pred_gold, hid_gold = decoder_ref(params, tokens, hidden, encoder_outputs,
                                      n_layers=LAYERS)

    pred, new_hidden = decoder_forward(prep, tokens, hidden, encoder_outputs)
    jax.block_until_ready(pred)
    jax.block_until_ready(new_hidden)

    assert pred.shape == (B, VOCAB) and new_hidden.shape == (LAYERS, B, H2)
    assert jnp.allclose(pred, pred_gold, atol=2e-2, rtol=2e-2)
    assert jnp.allclose(new_hidden, hid_gold, atol=2e-2, rtol=2e-2)
    print("KERNEL_OK")
</pallas_src>

<mosaic_0001>
module attributes {stable_mosaic.version = 11 : i64} {
  func.func @kernel(%arg0: memref<2x16xf32, #tpu.memory_space<vmem>>, %arg1: memref<2x2x32xf32, #tpu.memory_space<vmem>>, %arg2: memref<2x8x32xbf16, #tpu.memory_space<vmem>>, %arg3: memref<32x32xbf16, #tpu.memory_space<vmem>>, %arg4: memref<32x32xbf16, #tpu.memory_space<vmem>>, %arg5: memref<1x32xf32, #tpu.memory_space<vmem>>, %arg6: memref<1x32xf32, #tpu.memory_space<vmem>>, %arg7: memref<80x128xbf16, #tpu.memory_space<vmem>>, %arg8: memref<1x128xf32, #tpu.memory_space<vmem>>, %arg9: memref<64x128xbf16, #tpu.memory_space<vmem>>, %arg10: memref<1x128xf32, #tpu.memory_space<vmem>>, %arg11: memref<32x64xbf16, #tpu.memory_space<vmem>>, %arg12: memref<1x64xf32, #tpu.memory_space<vmem>>, %arg13: memref<64x128xbf16, #tpu.memory_space<vmem>>, %arg14: memref<1x128xf32, #tpu.memory_space<vmem>>, %arg15: memref<2x128xbf16, #tpu.memory_space<vmem>>, %arg16: memref<2x2x32xf32, #tpu.memory_space<vmem>>) attributes {dimension_semantics = [], scalar_prefetch = 0 : i64, scratch_operands = 0 : i64, tpu.core_type = #tpu.core_type<tc>} {
    %c0 = arith.constant 0 : index
    %c0_0 = arith.constant 0 : index
    %c0_1 = arith.constant 0 : index
    %0 = vector.load %arg2[%c0, %c0_0, %c0_1] : memref<2x8x32xbf16, #tpu.memory_space<vmem>>, vector<2x8x32xbf16>
    %c1 = arith.constant 1 : index
    %c0_2 = arith.constant 0 : index
    %c0_3 = arith.constant 0 : index
    %1 = vector.load %arg1[%c1, %c0_2, %c0_3] : memref<2x2x32xf32, #tpu.memory_space<vmem>>, vector<1x2x32xf32>
    %2 = vector.shape_cast %1 : vector<1x2x32xf32> to vector<2x32xf32>
    %3 = vector.shape_cast %0 : vector<2x8x32xbf16> to vector<16x32xbf16>
    %c0_4 = arith.constant 0 : index
    %c0_5 = arith.constant 0 : index
    %4 = vector.load %arg3[%c0_4, %c0_5] : memref<32x32xbf16, #tpu.memory_space<vmem>>, vector<32x32xbf16>
    %cst = arith.constant dense<0.000000e+00> : vector<16x32xf32>
    %5 = tpu.matmul %3, %4, %cst {dimension_numbers = #tpu.dot_dimension_numbers<[1], [0], [0], [1], [0, 0, 1, 1], [], []>} : vector<16x32xbf16>, vector<32x32xbf16>, vector<16x32xf32> -> vector<16x32xf32>
    %6 = vector.shape_cast %5 : vector<16x32xf32> to vector<2x8x32xf32>
    %7 = arith.truncf %2 : vector<2x32xf32> to vector<2x32xbf16>
    %c0_6 = arith.constant 0 : index
    %c0_7 = arith.constant 0 : index
    %8 = vector.load %arg4[%c0_6, %c0_7] : memref<32x32xbf16, #tpu.memory_space<vmem>>, vector<32x32xbf16>
    %cst_8 = arith.constant dense<0.000000e+00> : vector<2x32xf32>
    %9 = tpu.matmul %7, %8, %cst_8 {dimension_numbers = #tpu.dot_dimension_numbers<[1], [0], [0], [1], [0, 0, 1, 1], [], []>} : vector<2x32xbf16>, vector<32x32xbf16>, vector<2x32xf32> -> vector<2x32xf32>
    %10 = vector.shape_cast %9 : vector<2x32xf32> to vector<2x1x32xf32>
    %11 = vector.broadcast %10 : vector<2x1x32xf32> to vector<2x8x32xf32>
    %12 = arith.addf %6, %11 : vector<2x8x32xf32>
    %c0_9 = arith.constant 0 : index
    %c0_10 = arith.constant 0 : index
    %13 = vector.load %arg5[%c0_9, %c0_10] : memref<1x32xf32, #tpu.memory_space<vmem>>, vector<1x32xf32>
    %14 = vector.shape_cast %13 : vector<1x32xf32> to vector<1x1x32xf32>
    %15 = vector.broadcast %14 : vector<1x1x32xf32> to vector<2x8x32xf32>
    %16 = arith.addf %12, %15 : vector<2x8x32xf32>
    %17 = math.tanh %16 : vector<2x8x32xf32>
    %c0_11 = arith.constant 0 : index
    %c0_12 = arith.constant 0 : index
    %18 = vector.load %arg6[%c0_11, %c0_12] : memref<1x32xf32, #tpu.memory_space<vmem>>, vector<1x32xf32>
    %19 = vector.shape_cast %18 : vector<1x32xf32> to vector<1x1x32xf32>
    %20 = vector.broadcast %19 : vector<1x1x32xf32> to vector<2x8x32xf32>
    %21 = arith.mulf %17, %20 : vector<2x8x32xf32>
    %cst_13 = arith.constant dense<0.000000e+00> : vector<2x8xf32>
    %22 = vector.multi_reduction <add>, %21, %cst_13 [2] : vector<2x8x32xf32> to vector<2x8xf32>
    %cst_14 = arith.constant dense<0xFF800000> : vector<2xf32>
    %23 = vector.multi_reduction <maximumf>, %22, %cst_14 [1] : vector<2x8xf32> to vector<2xf32>
    %24 = vector.shape_cast %23 : vector<2xf32> to vector<2x1xf32>
    %25 = vector.broadcast %24 : vector<2x1xf32> to vector<2x8xf32>
    %26 = arith.subf %22, %25 : vector<2x8xf32>
    %27 = math.exp %26 : vector<2x8xf32>
    %cst_15 = arith.constant dense<0.000000e+00> : vector<2xf32>
    %28 = vector.multi_reduction <add>, %27, %cst_15 [1] : vector<2x8xf32> to vector<2xf32>
    %29 = vector.shape_cast %28 : vector<2xf32> to vector<2x1xf32>
    %30 = tpu.reciprocal %29 {approx = true} : vector<2x1xf32> -> vector<2x1xf32>
    %31 = vector.broadcast %30 : vector<2x1xf32> to vector<2x8xf32>
    %32 = arith.mulf %27, %31 : vector<2x8xf32>
    %33 = vector.shape_cast %32 : vector<2x8xf32> to vector<2x8x1xf32>
    %34 = arith.extf %0 : vector<2x8x32xbf16> to vector<2x8x32xf32>
    %35 = vector.broadcast %33 : vector<2x8x1xf32> to vector<2x8x32xf32>
    %36 = arith.mulf %35, %34 : vector<2x8x32xf32>
    %cst_16 = arith.constant dense<0.000000e+00> : vector<2x32xf32>
    %37 = vector.multi_reduction <add>, %36, %cst_16 [1] : vector<2x8x32xf32> to vector<2x32xf32>
    %c0_17 = arith.constant 0 : index
    %c0_18 = arith.constant 0 : index
    %38 = vector.load %arg0[%c0_17, %c0_18] : memref<2x16xf32, #tpu.memory_space<vmem>>, vector<2x16xf32>
    %c0_19 = arith.constant 0 : index
    %c0_20 = arith.constant 0 : index
    %39 = vector.load %arg7[%c0_19, %c0_20] : memref<80x128xbf16, #tpu.memory_space<vmem>>, vector<80x128xbf16>
    %c0_21 = arith.constant 0 : index
    %c0_22 = arith.constant 0 : index
    %40 = vector.load %arg8[%c0_21, %c0_22] : memref<1x128xf32, #tpu.memory_space<vmem>>, vector<1x128xf32>
    %c0_23 = arith.constant 0 : index
    %c0_24 = arith.constant 0 : index
    %c0_25 = arith.constant 0 : index
    %41 = vector.load %arg1[%c0_23, %c0_24, %c0_25] : memref<2x2x32xf32, #tpu.memory_space<vmem>>, vector<1x2x32xf32>
    %42 = vector.shape_cast %41 : vector<1x2x32xf32> to vector<2x32xf32>
    %43 = arith.truncf %38 : vector<2x16xf32> to vector<2x16xbf16>
    %44 = arith.truncf %37 : vector<2x32xf32> to vector<2x32xbf16>
    %45 = tpu.concatenate %43, %44 in 1 : vector<2x16xbf16>, vector<2x32xbf16> -> vector<2x48xbf16>
    %46 = arith.truncf %42 : vector<2x32xf32> to vector<2x32xbf16>
    %47 = tpu.concatenate %45, %46 in 1 : vector<2x48xbf16>, vector<2x32xbf16> -> vector<2x80xbf16>
    %cst_26 = arith.constant dense<0.000000e+00> : vector<2x128xf32>
    %48 = tpu.matmul %47, %39, %cst_26 {dimension_numbers = #tpu.dot_dimension_numbers<[1], [0], [0], [1], [0, 0, 1, 1], [], []>} : vector<2x80xbf16>, vector<80x128xbf16>, vector<2x128xf32> -> vector<2x128xf32>
    %49 = vector.broadcast %40 : vector<1x128xf32> to vector<2x128xf32>
    %50 = arith.addf %48, %49 : vector<2x128xf32>
    %51 = vector.extract_strided_slice %50 {offsets = [0, 0], sizes = [2, 32], strides = [1, 1]} : vector<2x128xf32> to vector<2x32xf32>
    %52 = arith.negf %51 : vector<2x32xf32>
    %53 = math.exp %52 : vector<2x32xf32>
    %cst_27 = arith.constant 1.000000e+00 : f32
    %54 = vector.broadcast %cst_27 : f32 to vector<2x32xf32>
    %55 = arith.addf %54, %53 : vector<2x32xf32>
    %56 = arith.divf %54, %55 : vector<2x32xf32>
    %57 = vector.extract_strided_slice %50 {offsets = [0, 32], sizes = [2, 32], strides = [1, 1]} : vector<2x128xf32> to vector<2x32xf32>
    %58 = arith.negf %57 : vector<2x32xf32>
    %59 = math.exp %58 : vector<2x32xf32>
    %cst_28 = arith.constant 1.000000e+00 : f32
    %60 = vector.broadcast %cst_28 : f32 to vector<2x32xf32>
    %61 = arith.addf %60, %59 : vector<2x32xf32>
    %62 = arith.divf %60, %61 : vector<2x32xf32>
    %63 = vector.extract_strided_slice %50 {offsets = [0, 64], sizes = [2, 32], strides = [1, 1]} : vector<2x128xf32> to vector<2x32xf32>
    %64 = vector.extract_strided_slice %50 {offsets = [0, 96], sizes = [2, 32], strides = [1, 1]} : vector<2x128xf32> to vector<2x32xf32>
    %65 = arith.mulf %56, %64 : vector<2x32xf32>
    %66 = arith.addf %63, %65 : vector<2x32xf32>
    %67 = math.tanh %66 : vector<2x32xf32>
    %cst_29 = arith.constant 1.000000e+00 : f32
    %68 = vector.broadcast %cst_29 : f32 to vector<2x32xf32>
    %69 = arith.subf %68, %62 : vector<2x32xf32>
    %70 = arith.mulf %69, %67 : vector<2x32xf32>
    %71 = arith.mulf %62, %42 : vector<2x32xf32>
    %72 = arith.addf %70, %71 : vector<2x32xf32>
    %c0_30 = arith.constant 0 : index
    %c0_31 = arith.constant 0 : index
    %c0_32 = arith.constant 0 : index
    %73 = vector.load %arg16[%c0_30, %c0_31, %c0_32] : memref<2x2x32xf32, #tpu.memory_space<vmem>>, vector<1x2x32xf32>
    %74 = vector.shape_cast %73 : vector<1x2x32xf32> to vector<2x32xf32>
    %75 = vector.shape_cast %72 : vector<2x32xf32> to vector<1x2x32xf32>
    tpu.vector_store %arg16[%c0_30, %c0_31, %c0_32], %75 {strides = array<i32>} : memref<2x2x32xf32, #tpu.memory_space<vmem>>, vector<1x2x32xf32>,
    %c0_33 = arith.constant 0 : index
    %c0_34 = arith.constant 0 : index
    %76 = vector.load %arg9[%c0_33, %c0_34] : memref<64x128xbf16, #tpu.memory_space<vmem>>, vector<64x128xbf16>
    %c0_35 = arith.constant 0 : index
    %c0_36 = arith.constant 0 : index
    %77 = vector.load %arg10[%c0_35, %c0_36] : memref<1x128xf32, #tpu.memory_space<vmem>>, vector<1x128xf32>
    %c1_37 = arith.constant 1 : index
    %c0_38 = arith.constant 0 : index
    %c0_39 = arith.constant 0 : index
    %78 = vector.load %arg1[%c1_37, %c0_38, %c0_39] : memref<2x2x32xf32, #tpu.memory_space<vmem>>, vector<1x2x32xf32>
    %79 = vector.shape_cast %78 : vector<1x2x32xf32> to vector<2x32xf32>
    %80 = arith.truncf %72 : vector<2x32xf32> to vector<2x32xbf16>
    %81 = arith.truncf %79 : vector<2x32xf32> to vector<2x32xbf16>
    %82 = tpu.concatenate %80, %81 in 1 : vector<2x32xbf16>, vector<2x32xbf16> -> vector<2x64xbf16>
    %cst_40 = arith.constant dense<0.000000e+00> : vector<2x128xf32>
    %83 = tpu.matmul %82, %76, %cst_40 {dimension_numbers = #tpu.dot_dimension_numbers<[1], [0], [0], [1], [0, 0, 1, 1], [], []>} : vector<2x64xbf16>, vector<64x128xbf16>, vector<2x128xf32> -> vector<2x128xf32>
    %84 = vector.broadcast %77 : vector<1x128xf32> to vector<2x128xf32>
    %85 = arith.addf %83, %84 : vector<2x128xf32>
    %86 = vector.extract_strided_slice %85 {offsets = [0, 0], sizes = [2, 32], strides = [1, 1]} : vector<2x128xf32> to vector<2x32xf32>
    %87 = arith.negf %86 : vector<2x32xf32>
    %88 = math.exp %87 : vector<2x32xf32>
    %cst_41 = arith.constant 1.000000e+00 : f32
    %89 = vector.broadcast %cst_41 : f32 to vector<2x32xf32>
    %90 = arith.addf %89, %88 : vector<2x32xf32>
    %91 = arith.divf %89, %90 : vector<2x32xf32>
    %92 = vector.extract_strided_slice %85 {offsets = [0, 32], sizes = [2, 32], strides = [1, 1]} : vector<2x128xf32> to vector<2x32xf32>
    %93 = arith.negf %92 : vector<2x32xf32>
    %94 = math.exp %93 : vector<2x32xf32>
    %cst_42 = arith.constant 1.000000e+00 : f32
    %95 = vector.broadcast %cst_42 : f32 to vector<2x32xf32>
    %96 = arith.addf %95, %94 : vector<2x32xf32>
    %97 = arith.divf %95, %96 : vector<2x32xf32>
    %98 = vector.extract_strided_slice %85 {offsets = [0, 64], sizes = [2, 32], strides = [1, 1]} : vector<2x128xf32> to vector<2x32xf32>
    %99 = vector.extract_strided_slice %85 {offsets = [0, 96], sizes = [2, 32], strides = [1, 1]} : vector<2x128xf32> to vector<2x32xf32>
    %100 = arith.mulf %91, %99 : vector<2x32xf32>
    %101 = arith.addf %98, %100 : vector<2x32xf32>
    %102 = math.tanh %101 : vector<2x32xf32>
    %cst_43 = arith.constant 1.000000e+00 : f32
    %103 = vector.broadcast %cst_43 : f32 to vector<2x32xf32>
    %104 = arith.subf %103, %97 : vector<2x32xf32>
    %105 = arith.mulf %104, %102 : vector<2x32xf32>
    %106 = arith.mulf %97, %79 : vector<2x32xf32>
    %107 = arith.addf %105, %106 : vector<2x32xf32>
    %c1_44 = arith.constant 1 : index
    %c0_45 = arith.constant 0 : index
    %c0_46 = arith.constant 0 : index
    %108 = vector.load %arg16[%c1_44, %c0_45, %c0_46] : memref<2x2x32xf32, #tpu.memory_space<vmem>>, vector<1x2x32xf32>
    %109 = vector.shape_cast %108 : vector<1x2x32xf32> to vector<2x32xf32>
    %110 = vector.shape_cast %107 : vector<2x32xf32> to vector<1x2x32xf32>
    tpu.vector_store %arg16[%c1_44, %c0_45, %c0_46], %110 {strides = array<i32>} : memref<2x2x32xf32, #tpu.memory_space<vmem>>, vector<1x2x32xf32>,
    %111 = arith.truncf %107 : vector<2x32xf32> to vector<2x32xbf16>
    %c0_47 = arith.constant 0 : index
    %c0_48 = arith.constant 0 : index
    %112 = vector.load %arg11[%c0_47, %c0_48] : memref<32x64xbf16, #tpu.memory_space<vmem>>, vector<32x64xbf16>
    %cst_49 = arith.constant dense<0.000000e+00> : vector<2x64xf32>
    %113 = tpu.matmul %111, %112, %cst_49 {dimension_numbers = #tpu.dot_dimension_numbers<[1], [0], [0], [1], [0, 0, 1, 1], [], []>} : vector<2x32xbf16>, vector<32x64xbf16>, vector<2x64xf32> -> vector<2x64xf32>
    %c0_50 = arith.constant 0 : index
    %c0_51 = arith.constant 0 : index
    %114 = vector.load %arg12[%c0_50, %c0_51] : memref<1x64xf32, #tpu.memory_space<vmem>>, vector<1x64xf32>
    %115 = vector.broadcast %114 : vector<1x64xf32> to vector<2x64xf32>
    %116 = arith.addf %113, %115 : vector<2x64xf32>
    %117 = arith.truncf %116 : vector<2x64xf32> to vector<2x64xbf16>
    %c0_52 = arith.constant 0 : index
    %c0_53 = arith.constant 0 : index
    %118 = vector.load %arg13[%c0_52, %c0_53] : memref<64x128xbf16, #tpu.memory_space<vmem>>, vector<64x128xbf16>
    %cst_54 = arith.constant dense<0.000000e+00> : vector<2x128xf32>
    %119 = tpu.matmul %117, %118, %cst_54 {dimension_numbers = #tpu.dot_dimension_numbers<[1], [0], [0], [1], [0, 0, 1, 1], [], []>} : vector<2x64xbf16>, vector<64x128xbf16>, vector<2x128xf32> -> vector<2x128xf32>
    %c0_55 = arith.constant 0 : index
    %c0_56 = arith.constant 0 : index
    %120 = vector.load %arg14[%c0_55, %c0_56] : memref<1x128xf32, #tpu.memory_space<vmem>>, vector<1x128xf32>
    %121 = vector.broadcast %120 : vector<1x128xf32> to vector<2x128xf32>
    %122 = arith.addf %119, %121 : vector<2x128xf32>
    %123 = arith.truncf %122 : vector<2x128xf32> to vector<2x128xbf16>
    %c0_57 = arith.constant 0 : index
    %c0_58 = arith.constant 0 : index
    %124 = vector.load %arg15[%c0_57, %c0_58] : memref<2x128xbf16, #tpu.memory_space<vmem>>, vector<2x128xbf16>
    tpu.vector_store %arg15[%c0_57, %c0_58], %123 {strides = array<i32>} : memref<2x128xbf16, #tpu.memory_space<vmem>>, vector<2x128xbf16>,
    return
  }
}

</mosaic_0001>

<bundles_post_ra>
// kernel: tpu_custom_call.1
= control target key start
LH: loop header
LB: loop body
LE: loop exit
PB: predicated region body
PF: predicated region fallthrough
CT: control target
= control target key end

     0   :  { %s1785_s0 = inlined_call_operand.vmem [shape: f32[2,16], index: 0, kind: input, shape index: {}]   ;;  %s1786_s1 = inlined_call_operand.hbm [shape: f32[2,2,32], index: 1, kind: input, shape index: {}, may-alias: {1,16}]   ;;  %s1787_s2 = inlined_call_operand.vmem [shape: bf16[2,8,32], index: 2, kind: input, shape index: {}]   ;;  %s1788_s3 = inlined_call_operand.vmem [shape: bf16[32,32], index: 3, kind: input, shape index: {}]   ;;  %s1789_s4 = inlined_call_operand.vmem [shape: bf16[32,32], index: 4, kind: input, shape index: {}]   ;;  %s1790_s5 = inlined_call_operand.vmem [shape: f32[1,32], index: 5, kind: input, shape index: {}]   ;;  %s1791_s6 = inlined_call_operand.hbm [shape: f32[1,32], index: 6, kind: input, shape index: {}]   ;;  %s1792_s7 = inlined_call_operand.hbm [shape: bf16[80,128], index: 7, kind: input, shape index: {}]   ;;  %s1793_s8 = inlined_call_operand.hbm [shape: f32[1,128], index: 8, kind: input, shape index: {}]   ;;  %s1794_s9 = inlined_call_operand.hbm [shape: bf16[64,128], index: 9, kind: input, shape index: {}]   ;;  %s1795_s10 = inlined_call_operand.hbm [shape: f32[1,128], index: 10, kind: input, shape index: {}]   ;;  %s1796_s11 = inlined_call_operand.hbm [shape: bf16[32,64], index: 11, kind: input, shape index: {}]   ;;  %s1797_s12 = inlined_call_operand.hbm [shape: f32[1,64], index: 12, kind: input, shape index: {}]   ;;  %s1798_s13 = inlined_call_operand.hbm [shape: bf16[64,128], index: 13, kind: input, shape index: {}]   ;;  %s1799_s14 = inlined_call_operand.hbm [shape: f32[1,128], index: 14, kind: input, shape index: {}]   ;;  %s1800_s15 = inlined_call_operand.hbm [shape: bf16[2,128], index: 15, kind: output, shape index: {0}]   ;;  %s1801_s16 = inlined_call_operand.hbm [shape: f32[2,2,32], index: 16, kind: output, shape index: {1}, may-alias: {1,16}]  }
   0x1   :  { %1802 = sst [smem:[#allocation30_spill]] %s1785_s0 }
   0x2   :  { %22 = vsyncpa [#allocation3], 0 }
   0x3   :  { %23 = vsyncpa [#allocation6], 0 }
   0x4   :  { %24 = vsyncpa [#allocation9], 0 }
   0x5   :  { %25 = vsyncpa [#allocation12], 0 }
   0x6   :  { %26 = vsyncpa [#allocation15], 0 }
   0x7   :  { %27 = vsyncpa [#allocation18], 0 }
   0x8   :  { %28 = vsyncpa [#allocation4], 0 }
   0x9   :  { %29 = vsyncpa [#allocation21], 0  ;;  %s1409_s21 = smov [#allocation5]   ;;  %s1410_s23 = smov [#allocation8]  }
   0xa   :  { %s58_s22 = sshll.u32 %s1409_s21, 4  ;;  %s80_s24 = sshll.u32 %s1410_s23, 4  ;;  %s59_s22 = int_to_ptr.vmem [resolvable:$true] %s58_s22  ;;  %s81_s24 = int_to_ptr.vmem [resolvable:$true] %s80_s24 }
   0xb   :  { %s1129_s27 = scalar_lea.hbm %s1791_s6, 16 }
   0xc   :  { %p1130_p0 = scmp.ne.s32.totalorder %s1791_s6, %s1129_s27  ;;  %p1133_p1 = scmp.lt.u32.totalorder %s1129_s27, %s1791_s6 }
   0xe   :  { %p1135_p2 = pnand %p1133_p1, %p1130_p0 }
  0x10   :  { %1138 = shalt.err (!%p1135_p2)
}
  0x11   :  { %s1139_s17 = scalar_lea.vmem %s59_s22, 16  ;;  %s1143_s18 = scalar_lea.vmem %s59_s22, 32 }
  0x12   :  { %p1140_p3 = scmp.ne.s32.totalorder %s59_s22, %s1139_s17  ;;  %p1144_p4 = scmp.lt.s32.totalorder %s59_s22, %s59_s22 }
  0x13   :  { %p1145_p5 = scmp.lt.s32.totalorder %s1143_s18, %s1139_s17 }
  0x15   :  { %p1146_p6 = por %p1145_p5, %p1144_p4 }
  0x17   :  { %p1147_p7 = pnand %p1146_p6, %p1140_p3 }
  0x19   :  { %1150 = shalt.err (!%p1147_p7)
}
  0x1a   :  { %61 = dma.hbm_to_vmem [thread:$0]  %s1791_s6, 16, %s59_s22, [#allocation6]  }
  0x1b   :  { %s1151_s25 = scalar_lea.hbm %s1793_s8, 16 }
  0x1c   :  { %p1152_p8 = scmp.ne.s32.totalorder %s1793_s8, %s1151_s25  ;;  %p1155_p9 = scmp.lt.u32.totalorder %s1151_s25, %s1793_s8 }
  0x1e   :  { %p1157_p10 = pnand %p1155_p9, %p1152_p8 }
  0x20   :  { %1160 = shalt.err (!%p1157_p10)
}
  0x21   :  { %s1161_s30 = scalar_lea.vmem %s81_s24, 16  ;;  %s1165_s0 = scalar_lea.vmem %s81_s24, 32 }
  0x22   :  { %p1162_p11 = scmp.ne.s32.totalorder %s81_s24, %s1161_s30  ;;  %p1166_p12 = scmp.lt.s32.totalorder %s81_s24, %s81_s24 }
  0x23   :  { %p1167_p13 = scmp.lt.s32.totalorder %s1165_s0, %s1161_s30 }
  0x25   :  { %p1168_p0 = por %p1167_p13, %p1166_p12 }
  0x27   :  { %p1169_p1 = pnand %p1168_p0, %p1162_p11 }
  0x29   :  { %1172 = shalt.err (!%p1169_p1)
}
  0x2a   :  { %83 = dma.hbm_to_vmem [thread:$0]  %s1793_s8, 16, %s81_s24, [#allocation9]  }
  0x2b   :  { %s1411_s17 = smov [#allocation11]   ;;  %s1412_s19 = smov [#allocation14]  }
  0x2c   :  { %s102_s18 = sshll.u32 %s1411_s17, 4  ;;  %s124_s20 = sshll.u32 %s1412_s19, 4  ;;  %s103_s18 = int_to_ptr.vmem [resolvable:$true] %s102_s18  ;;  %s125_s20 = int_to_ptr.vmem [resolvable:$true] %s124_s20 }
  0x2d   :  { %s1173_s25 = scalar_lea.hbm %s1795_s10, 16 }
  0x2e   :  { %p1174_p2 = scmp.ne.s32.totalorder %s1795_s10, %s1173_s25  ;;  %p1177_p3 = scmp.lt.u32.totalorder %s1173_s25, %s1795_s10 }
  0x30   :  { %p1179_p4 = pnand %p1177_p3, %p1174_p2 }
  0x32   :  { %1182 = shalt.err (!%p1179_p4)
}
  0x33   :  { %s1183_s8 = scalar_lea.vmem %s103_s18, 16  ;;  %s1187_s24 = scalar_lea.vmem %s103_s18, 32 }
  0x34   :  { %p1184_p5 = scmp.ne.s32.totalorder %s103_s18, %s1183_s8  ;;  %p1188_p6 = scmp.lt.s32.totalorder %s103_s18, %s103_s18 }
  0x35   :  { %p1189_p7 = scmp.lt.s32.totalorder %s1187_s24, %s1183_s8 }
  0x37   :  { %p1190_p8 = por %p1189_p7, %p1188_p6 }
  0x39   :  { %p1191_p9 = pnand %p1190_p8, %p1184_p5 }
  0x3b   :  { %1194 = shalt.err (!%p1191_p9)
}
  0x3c   :  { %105 = dma.hbm_to_vmem [thread:$0]  %s1795_s10, 16, %s103_s18, [#allocation12]  }
  0x3d   :  { %s1195_s17 = scalar_lea.hbm %s1797_s12, 16 }
  0x3e   :  { %p1196_p10 = scmp.ne.s32.totalorder %s1797_s12, %s1195_s17  ;;  %p1199_p11 = scmp.lt.u32.totalorder %s1195_s17, %s1797_s12 }
  0x40   :  { %p1201_p12 = pnand %p1199_p11, %p1196_p10 }
  0x42   :  { %1204 = shalt.err (!%p1201_p12)
}
  0x43   :  { %s1205_s26 = scalar_lea.vmem %s125_s20, 16  ;;  %s1209_s27 = scalar_lea.vmem %s125_s20, 32 }
  0x44   :  { %p1206_p13 = scmp.ne.s32.totalorder %s125_s20, %s1205_s26  ;;  %p1210_p0 = scmp.lt.s32.totalorder %s125_s20, %s125_s20 }
  0x45   :  { %p1211_p1 = scmp.lt.s32.totalorder %s1209_s27, %s1205_s26 }
  0x47   :  { %p1212_p2 = por %p1211_p1, %p1210_p0 }
  0x49   :  { %p1213_p3 = pnand %p1212_p2, %p1206_p13 }
  0x4b   :  { %1216 = shalt.err (!%p1213_p3)
}
  0x4c   :  { %127 = dma.hbm_to_vmem [thread:$0]  %s1797_s12, 16, %s125_s20, [#allocation15]  }
  0x4d   :  { %s1413_s28 = smov [#allocation2]   ;;  %s1217_s30 = scalar_lea.hbm %s1786_s1, 64 }
  0x4e   :  { %s37_s29 = sshll.u32 %s1413_s28, 4  ;;  %p1218_p4 = scmp.ne.s32.totalorder %s1786_s1, %s1217_s30  ;;  %s38_s29 = int_to_ptr.vmem [resolvable:$true] %s37_s29 }
  0x4f   :  { %p1221_p5 = scmp.lt.u32.totalorder %s1217_s30, %s1786_s1 }
  0x51   :  { %p1223_p6 = pnand %p1221_p5, %p1218_p4 }
  0x53   :  { %1226 = shalt.err (!%p1223_p6)
}
  0x54   :  { %s1227_s19 = scalar_lea.vmem %s38_s29, 64  ;;  %p1232_p8 = scmp.lt.s32.totalorder %s38_s29, %s38_s29 }
  0x55   :  { %p1228_p7 = scmp.ne.s32.totalorder %s38_s29, %s1227_s19  ;;  %p1233_p9 = scmp.lt.s32.totalorder %s1227_s19, %s1227_s19 }
  0x57   :  { %p1234_p10 = por %p1233_p9, %p1232_p8 }
  0x59   :  { %p1235_p11 = pnand %p1234_p10, %p1228_p7 }
  0x5b   :  { %1238 = shalt.err (!%p1235_p11)
}
  0x5c   :  { %s1414_s12 = smov 32   ;;  %s1415_s20 = smov 2  }
  0x5d   :  { %43 = dma.hbm_to_vmem [thread:$0]  %s1786_s1, 64, %s38_s29, [#allocation3], %s1414_s12, %s1414_s12, %s1415_s20  }
  0x5e   :  { %s1416_s25 = smov [#allocation7]   ;;  %s1239_s18 = scalar_lea.hbm %s1792_s7, 640 }
  0x5f   :  { %s67_s26 = sshll.u32 %s1416_s25, 4  ;;  %p1240_p12 = scmp.ne.s32.totalorder %s1792_s7, %s1239_s18  ;;  %s68_s26 = int_to_ptr.vmem [resolvable:$true] %s67_s26 }
  0x60   :  { %p1243_p13 = scmp.lt.u32.totalorder %s1239_s18, %s1792_s7 }
  0x62   :  { %p1245_p0 = pnand %p1243_p13, %p1240_p12 }
  0x64   :  { %1248 = shalt.err (!%p1245_p0)
}
  0x65   :  { %s1249_s0 = scalar_lea.vmem %s68_s26, 640  ;;  %p1254_p2 = scmp.lt.s32.totalorder %s68_s26, %s68_s26 }
  0x66   :  { %p1250_p1 = scmp.ne.s32.totalorder %s68_s26, %s1249_s0  ;;  %p1255_p3 = scmp.lt.s32.totalorder %s1249_s0, %s1249_s0 }
  0x68   :  { %p1256_p4 = por %p1255_p3, %p1254_p2 }
  0x6a   :  { %p1257_p5 = pnand %p1256_p4, %p1250_p1 }
  0x6c   :  { %1260 = shalt.err (!%p1257_p5)
}
  0x6d   :  { %s1417_s1 = smov 64   ;;  %s1418_s29 = smov 4  }
  0x6e   :  { %73 = dma.hbm_to_vmem [thread:$0]  %s1792_s7, 640, %s68_s26, [#allocation6], %s1417_s1, %s1417_s1, %s1418_s29  }
  0x6f   :  { %s1419_s17 = smov [#allocation10]   ;;  %s1420_s21 = smov [#allocation13]  }
  0x70   :  { %s89_s19 = sshll.u32 %s1419_s17, 4  ;;  %s111_s23 = sshll.u32 %s1420_s21, 4  ;;  %s90_s19 = int_to_ptr.vmem [resolvable:$true] %s89_s19  ;;  %s1595_s23 = int_to_ptr.vmem [resolvable:$true] %s111_s23 }
  0x71   :  { %s1261_s10 = scalar_lea.hbm %s1794_s9, 512 }
  0x72   :  { %p1262_p6 = scmp.ne.s32.totalorder %s1794_s9, %s1261_s10  ;;  %p1265_p7 = scmp.lt.u32.totalorder %s1261_s10, %s1794_s9 }
  0x74   :  { %p1267_p8 = pnand %p1265_p7, %p1262_p6 }
  0x76   :  { %1270 = shalt.err (!%p1267_p8)
}
  0x77   :  { %s1271_s7 = scalar_lea.vmem %s90_s19, 512  ;;  %p1276_p10 = scmp.lt.s32.totalorder %s90_s19, %s90_s19 }
  0x78   :  { %p1272_p9 = scmp.ne.s32.totalorder %s90_s19, %s1271_s7  ;;  %p1277_p11 = scmp.lt.s32.totalorder %s1271_s7, %s1271_s7 }
  0x7a   :  { %p1278_p12 = por %p1277_p11, %p1276_p10 }
  0x7c   :  { %p1279_p13 = pnand %p1278_p12, %p1272_p9 }
  0x7e   :  { %1282 = shalt.err (!%p1279_p13)
}
  0x7f   :  { %95 = dma.hbm_to_vmem [thread:$0]  %s1794_s9, 512, %s90_s19, [#allocation9], %s1417_s1, %s1417_s1, %s1418_s29  }
  0x80   :  { %s1283_s22 = scalar_lea.hbm %s1796_s11, 256 }
  0x81   :  { %p1284_p0 = scmp.ne.s32.totalorder %s1796_s11, %s1283_s22  ;;  %p1287_p1 = scmp.lt.u32.totalorder %s1283_s22, %s1796_s11 }
  0x83   :  { %p1289_p2 = pnand %p1287_p1, %p1284_p0 }
  0x85   :  { %1292 = shalt.err (!%p1289_p2)
}
  0x86   :  { %s1293_s10 = scalar_lea.vmem %s1595_s23, 256  ;;  %p1298_p4 = scmp.lt.s32.totalorder %s1595_s23, %s1595_s23 }
  0x87   :  { %p1294_p3 = scmp.ne.s32.totalorder %s1595_s23, %s1293_s10  ;;  %p1299_p5 = scmp.lt.s32.totalorder %s1293_s10, %s1293_s10 }
  0x89   :  { %p1300_p6 = por %p1299_p5, %p1298_p4 }
  0x8b   :  { %p1301_p7 = pnand %p1300_p6, %p1294_p3 }
  0x8d   :  { %1304 = shalt.err (!%p1301_p7)
}
  0x8e   :  { %117 = dma.hbm_to_vmem [thread:$0]  %s1796_s11, 256, %s1595_s23, [#allocation12], %s1417_s1, %s1417_s1, %s1418_s29  }
  0x8f   :  { %s1421_s18 = smov [#allocation16]   ;;  %s1422_s8 = smov [#allocation17]  }
  0x90   :  { %s133_s28 = sshll.u32 %s1421_s18, 4  ;;  %s146_s24 = sshll.u32 %s1422_s8, 4  ;;  %s134_s28 = int_to_ptr.vmem [resolvable:$true] %s133_s28  ;;  %s147_s24 = int_to_ptr.vmem [resolvable:$true] %s146_s24 }
  0x91   :  { %s1305_s30 = scalar_lea.hbm %s1798_s13, 512 }
  0x92   :  { %p1306_p8 = scmp.ne.s32.totalorder %s1798_s13, %s1305_s30  ;;  %p1309_p9 = scmp.lt.u32.totalorder %s1305_s30, %s1798_s13 }
  0x94   :  { %p1311_p10 = pnand %p1309_p9, %p1306_p8 }
  0x96   :  { %1314 = shalt.err (!%p1311_p10)
}
  0x97   :  { %s1315_s11 = scalar_lea.vmem %s134_s28, 512  ;;  %p1320_p12 = scmp.lt.s32.totalorder %s134_s28, %s134_s28 }
  0x98   :  { %p1316_p11 = scmp.ne.s32.totalorder %s134_s28, %s1315_s11  ;;  %p1321_p13 = scmp.lt.s32.totalorder %s1315_s11, %s1315_s11 }
  0x9a   :  { %p1322_p0 = por %p1321_p13, %p1320_p12 }
  0x9c   :  { %p1323_p1 = pnand %p1322_p0, %p1316_p11 }
  0x9e   :  { %1326 = shalt.err (!%p1323_p1)
}
  0x9f   :  { %139 = dma.hbm_to_vmem [thread:$0]  %s1798_s13, 512, %s134_s28, [#allocation15], %s1417_s1, %s1417_s1, %s1418_s29  }
  0xa0   :  { %s1327_s10 = scalar_lea.hbm %s1799_s14, 16 }
  0xa1   :  { %p1328_p2 = scmp.ne.s32.totalorder %s1799_s14, %s1327_s10  ;;  %p1331_p3 = scmp.lt.u32.totalorder %s1327_s10, %s1799_s14 }
  0xa3   :  { %p1333_p4 = pnand %p1331_p3, %p1328_p2 }
  0xa5   :  { %1336 = shalt.err (!%p1333_p4)
}
  0xa6   :  { %s1337_s7 = scalar_lea.vmem %s147_s24, 16  ;;  %s1341_s26 = scalar_lea.vmem %s147_s24, 32 }
  0xa7   :  { %p1338_p5 = scmp.ne.s32.totalorder %s147_s24, %s1337_s7  ;;  %p1342_p6 = scmp.lt.s32.totalorder %s147_s24, %s147_s24 }
  0xa8   :  { %p1343_p7 = scmp.lt.s32.totalorder %s1341_s26, %s1337_s7 }
  0xaa   :  { %p1344_p8 = por %p1343_p7, %p1342_p6 }
  0xac   :  { %p1345_p9 = pnand %p1344_p8, %p1338_p5 }
  0xae   :  { %1348 = shalt.err (!%p1345_p9)
}
  0xaf   :  { %149 = dma.hbm_to_vmem [thread:$0]  %s1799_s14, 16, %s147_s24, [#allocation18]  }
  0xb0   :  { %1393 = dma.done.wait [#allocation3], 64  }
  0xb1   :  { %1394 = vsyncadd [#allocation3], 4294967232 }
  0xb2   :  { %1395 = dma.done.wait [#allocation6], 656  }
  0xb3   :  { %1396 = vsyncadd [#allocation6], 4294966640 }
  0xb4   :  { %1397 = dma.done.wait [#allocation9], 528  }
  0xb5   :  { %1398 = vsyncadd [#allocation9], 4294966768 }
  0xb6   :  { %1399 = dma.done.wait [#allocation12], 272  }
  0xb7   :  { %1400 = vsyncadd [#allocation12], 4294967024 }
  0xb8   :  { %1401 = dma.done.wait [#allocation15], 528  }
  0xb9   :  { %1402 = vsyncadd [#allocation15], 4294966768 }
  0xba   :  { %1403 = dma.done.wait [#allocation18], 16  }
  0xbb   :  { %1404 = vsyncadd [#allocation18], 4294967280  ;;  %v1423_v0 = vmov 0.0   ;;  %vm1424_vm0 = vmmov 0   ;;  %v1086_v1 = vld [vmem:[%s1788_s3] sm:$0xff]   ;;  %v1087_v2 = vld [vmem:[%s1788_s3 + $0x8] sm:$0xff]   ;;  %v315_v10 = vlaneseq }
  0xbc   :  { %999 = vmatprep.subr.bf16.mxu1 %v1423_v0  ;;  %1003 = vmatprep.mubr.msk.bf16.mxu1 %vm1424_vm0, %v1423_v0  ;;  %v1674_v3 = vld [vmem:[%s1787_s2] sm:$0xff]   ;;  %vm206_vm1 = vcmask 261120   ;;  %v1090_v5 = vld [vmem:[%s1789_s4 + $0x8] sm:$0xff]   ;;  %v1425_v8 = vmov 1966171168   ;;  %vm384_vm2 = vcmask 1041409  }
  0xbd   :  { %1015 = vmatprep.subr.bf16.mxu0 %v1423_v0  ;;  %1025 = vmatprep.mubr.msk.bf16.mxu0 %vm1424_vm0, %v1423_v0  ;;  %v1089_v4 = vld [vmem:[%s1789_s4] sm:$0xff]   ;;  %v313_v9 = vunpack.c.l.s4 %v1425_v8  ;;  %v1693_v14 = vshrl.u32 %v315_v10, 7  ;;  %v375_v41 = vand.u32 127, %v315_v10  ;;  %vm387_vm3 = vcmask 58368   ;;  %s1427_s4 = smov 48   ;;  %s1803_s27 = sld [smem:[#allocation30_spill]] }
  0xbe   :  { %1000 = vmatpush3.bf16.msra.mxu1 %v1086_v1  ;;  %v184_v6 = vld [vmem:[#allocation2 + $0x2] sm:$0x3]  ;;  %v947_v28 = vld [vmem:[%s1790_s5] ss:$0 sm:$0xff]  ;;  %v948_v34 = vld [vmem:[#allocation5] ss:$0 sm:$0xff] }
  0xbf   :  { %1001 = vmatprep.subr.bf16.mxu1 %v1423_v0  ;;  %v251_v7 = vpack.c.bf16 %v184_v6, %v184_v6  ;;  %v314_v13 = vunpack.c.0.s8 %v313_v9  ;;  %v1697_v20 = vsub.s32 0, %v1693_v14  ;;  %v378_v43 = vsub.s32 %v375_v41, %v1693_v14  ;;  %v483_v10 = vld [vmem:[#allocation2] sm:$0x3]  ;;  %s1428_s5 = smov 16   ;;  %s1429_s10 = smov 96  }
  0xc0   :  { %v1426_v49 = vmov 0   ;;  %v398_v50 = vsub.s32 1, %v1693_v14  ;;  %vm495_vm4 = vcmask 130048   ;;  %vm503_vm5 = vcmask 392192  }
  0xc1   :  { %v317_v17 = vsub.s32 %v314_v13, %v1693_v14  ;;  %1085 = vset.pattern.permute.xlu0 %v1426_v49  ;;  %1084 = vset.pattern.permute.xlu1 %v1426_v49  ;;  %v1092_v13 = vld [vmem:[#allocation7 + $0x8] sm:$0xff]   ;;  %v1093_v14 = vld [vmem:[#allocation7 + $0x10] sm:$0xff]   ;;  %vm542_vm6 = vcmask 654336   ;;  %vm671_vm7 = vcmask 523264   ;;  %vm618_vm8 = vcmask 254976  }
  0xc2   :  { %1002 = vmatpush3.bf16.msra.mxu1 %v1087_v2 }
  0xc3   :  { %1007 = vmatprep.subr.bf16.mxu1 %v1423_v0 }
  0xc5   :  { %1004 = vmatmul.mubr.msk.bf16.vlgmr.msra.gmra.mrb[0].mxu1 %vm206_vm1, %v1674_v3 }
  0xc6   :  { %1008 = vmatpush3.bf16.msra.mxu1 %v1089_v4  ;;  %1011 = vmatprep.mubr.msk.bf16.mxu1 %vm1424_vm0, %v1423_v0 }
  0xc7   :  { %1009 = vmatprep.subr.bf16.mxu1 %v1423_v0 }
  0xca   :  { %1010 = vmatpush3.bf16.msra.mxu1 %v1090_v5 }
  0xcb   :  { %1029 = vmatprep.subr.bf16.mxu1 %v1423_v0 }
  0xcd   :  { %1012 = vmatmul.mubr.msk.bf16.vlgmr.msra.gmra.mrb[4].mxu1 %vm206_vm1, %v251_v7 }
  0xce   :  { %1037 = vmatprep.mubr.msk.bf16.mxu1 %vm1424_vm0, %v1423_v0 }
 0x198   :  { %v244_v11 = vpop.f32.mrb[0].mxu1 }
 0x199   :  { %v1005_v12 = vpop.f32.mrb[1].mxu1 }
 0x19a   :  { %v247_v15 = vpop.f32.mrb[2].mxu1  ;;  %v1091_v12 = vld [vmem:[#allocation7] sm:$0xff]  }
 0x19b   :  { %v1006_v16 = vpop.f32.mrb[3].mxu1  ;;  %1016 = vmatpush3.bf16.msra.mxu0 %v1091_v12 }
 0x19c   :  { %1017 = vmatprep.subr.bf16.mxu0 %v1423_v0  ;;  %v1095_v16 = vld [vmem:[#allocation7 + $0x20] sm:$0xff]  }
 0x19f   :  { %1018 = vmatpush3.bf16.msra.mxu0 %v1092_v13 }
 0x1a0   :  { %v305_v18 = vpop.f32.mrb[4].mxu1  ;;  %1019 = vmatprep.subr.bf16.mxu0 %v1423_v0 }
 0x1a1   :  { %v318_v19 = vrot.slane %v305_v18, %v317_v17  ;;  %v1013_v21 = vpop.f32.mrb[5].mxu1 }
 0x1a2   :  { %v308_v22 = vpop.f32.mrb[6].mxu1 }
 0x1a3   :  { %v319_v23 = vcombine.high %v318_v19, %v318_v19  ;;  %v326_v24 = vrot.slane %v318_v19, %v317_v17  ;;  %v1014_v25 = vpop.f32.mrb[7].mxu1  ;;  %1020 = vmatpush3.bf16.msra.mxu0 %v1093_v14 }
 0x1a4   :  { %1021 = vmatprep.subr.bf16.mxu0 %v1423_v0 }
 0x1a5   :  { %v333_v26 = vrot.slane %v319_v23, %v317_v17  ;;  %v337_v27 = vrot.slane %v326_v24, %v1697_v20  ;;  %v443_v17 = vunpack.c.l.bf16 %v1674_v3 }
 0x1a7   :  { %v341_v29 = vrot.slane %v333_v26, %v1697_v20  ;;  %v344_v30 = vadd.f32 %v337_v27, %v244_v11  ;;  %v499_v11 = vpack.c.bf16 %v483_v10, %v483_v10 }
 0x1a9   :  { %v345_v31 = vadd.f32 %v341_v29, %v247_v15  ;;  %v353_v32 = vadd.f32 %v947_v28, %v344_v30  ;;  %v1094_v15 = vld [vmem:[#allocation7 + $0x18] sm:$0xff]  }
 0x1aa   :  { %1022 = vmatpush3.bf16.msra.mxu0 %v1094_v15 }
 0x1ab   :  { %v354_v33 = vadd.f32 %v947_v28, %v345_v31  ;;  %1107 = vtanh.f32 %v353_v32  ;;  %1023 = vmatprep.subr.bf16.mxu0 %v1423_v0 }
 0x1ad   :  { %1109 = vtanh.f32 %v354_v33 }
 0x1ae   :  { %1024 = vmatpush3.bf16.msra.mxu0 %v1095_v16 }
 0x1af   :  { %1049 = vmatprep.subr.bf16.mxu0 %v1423_v0 }
 0x1b5   :  { %v1108_v35 = vpop.eup %1107 }
 0x1b6   :  { %v364_v36 = vmul.f32 %v1108_v35, %v948_v34 }
 0x1b7   :  { %v1110_v37 = vpop.eup %1109 }
 0x1b8   :  { %v366_v38 = vsel %vm206_vm1, %v364_v36, 0.0  ;;  %v365_v39 = vmul.f32 %v1110_v37, %v948_v34 }
 0x1b9   :  { %367 = vadd.xlane.f32.xlu0 %v366_v38 }
 0x1ba   :  { %v369_v40 = vsel %vm206_vm1, %v365_v39, 0.0 }
 0x1bd   :  { %370 = vadd.xlane.f32.xlu0 %v369_v40 }
 0x246   :  { %v368_v42 = vpop.xlane.xlu0 %367 }
 0x247   :  { %v379_v45 = vrot.slane %v368_v42, %v378_v43 }
 0x24a   :  { %v371_v44 = vpop.xlane.xlu0 %370 }
 0x24b   :  { %v383_v46 = vrot.slane %v371_v44, %v378_v43 }
 0x24d   :  { %v385_v47 = vsel %vm384_vm2, %v383_v46, %v379_v45 }
 0x24e   :  { %v388_v48 = vsel %vm387_vm3, %v385_v47, -inf }
 0x24f   :  { %389 = vmax.xlane.f32.xlu1 %v388_v48  ;;  %v949_v48 = vld [vmem:[#allocation8] ss:$0 sm:$0xff] }
 0x2dc   :  { %v390_v51 = vpop.xlane.xlu1 %389 }
 0x2dd   :  { %v395_v52 = vrot.slane %v390_v51, %v1697_v20  ;;  %v399_v53 = vrot.slane %v390_v51, %v398_v50 }
 0x2df   :  { %v402_v54 = vsub.f32 %v368_v42, %v395_v52  ;;  %v403_v55 = vsub.f32 %v371_v44, %v399_v53  ;;  %v471_v42 = vld [vmem:[%s1803_s27] sm:$0x3] }
 0x2e1   :  { %v404_v56 = vmul.f32 1.442695, %v402_v54  ;;  %v406_v57 = vmul.f32 1.442695, %v403_v55 }
 0x2e3   :  { %1111 = vpow2.f32 %v404_v56 }
 0x2e4   :  { %1113 = vpow2.f32 %v406_v57 }
 0x2ed   :  { %v1112_v58 = vpop.eup %1111 }
 0x2ee   :  { %v1114_v59 = vpop.eup %1113  ;;  %411 = vperm.xlu1 %1084, %v1112_v58  }
 0x2ef   :  { %414 = vperm.xlu0 %1085, %v1114_v59  }
 0x36d   :  { %v412_v60 = vpop.permute.xlu1 %411 }
 0x36e   :  { %v415_v61 = vpop.permute.xlu0 %414  ;;  %v419_v62 = vrot.slane %v412_v60, %v378_v43 }
 0x36f   :  { %v423_v63 = vrot.slane %v415_v61, %v378_v43  ;;  %v484_v43 = vpack.c.bf16 %v471_v42, %v471_v42  ;;  %v1104_v42 = vld [vmem:[#allocation16 + $0x10] sm:$0xff]  }
 0x371   :  { %v424_v1 = vsel %vm384_vm2, %v423_v63, %v419_v62  ;;  %v629_v62 = vld [vmem:[#allocation2 + $0x2] sm:$0x3] }
 0x372   :  { %v426_v2 = vsel %vm387_vm3, %v424_v1, 0.0  ;;  %v631_v63 = vpack.c.bf16 %v629_v62, %v629_v62  ;;  %v1096_v1 = vld [vmem:[#allocation10] sm:$0xff]  }
 0x373   :  { %427 = vadd.xlane.f32.xlu1 %v426_v2  ;;  %1030 = vmatpush3.bf16.msra.mxu1 %v1096_v1  ;;  %v1097_v2 = vld [vmem:[#allocation10 + $0x8] sm:$0xff]  }
 0x374   :  { %1031 = vmatprep.subr.bf16.mxu1 %v1423_v0 }
 0x377   :  { %1032 = vmatpush3.bf16.msra.mxu1 %v1097_v2 }
 0x378   :  { %1033 = vmatprep.subr.bf16.mxu1 %v1423_v0 }
 0x400   :  { %v428_v4 = vpop.xlane.xlu1 %427 }
 0x401   :  { %1115 = vrcp.f32 %v428_v4 }
 0x40b   :  { %v1116_v5 = vpop.eup %1115 }
 0x40c   :  { %v434_v6 = vrot.slane %v1116_v5, %v1697_v20  ;;  %v438_v8 = vrot.slane %v1116_v5, %v398_v50  ;;  %v444_v20 = vunpack.c.h.bf16 %v1674_v3  ;;  %v1098_v5 = vld [vmem:[#allocation10 + $0x10] sm:$0xff]  }
 0x40d   :  { %1034 = vmatpush3.bf16.msra.mxu1 %v1098_v5 }
 0x40e   :  { %v441_v7 = vmul.f32 %v1112_v58, %v434_v6  ;;  %v442_v9 = vmul.f32 %v1114_v59, %v438_v8  ;;  %v1099_v6 = vld [vmem:[#allocation10 + $0x18] sm:$0xff]   ;;  %1035 = vmatprep.subr.bf16.mxu1 %v1423_v0 }
 0x410   :  { %447 = vperm.xlu0 %1085, %v441_v7  }
 0x411   :  { %1036 = vmatpush3.bf16.msra.mxu1 %v1099_v6 }
 0x412   :  { %1041 = vmatprep.subr.bf16.mxu1 %v1423_v0 }
 0x414   :  { %452 = vperm.xlu0 %1085, %v442_v9  }
 0x418   :  { %501 = vrot.lane.b32.xlu0 %v499_v11, %s1427_s4 }
 0x48f   :  { %v448_v18 = vpop.permute.xlu0 %447 }
 0x490   :  { %v455_v19 = vmul.f32 %v448_v18, %v443_v17  ;;  %v957_v17 = vld [vmem:[#allocation11] ss:$0 sm:$0xff] }
 0x492   :  { %v457_v21 = vsel %vm206_vm1, %v455_v19, 0.0 }
 0x493   :  { %v458_v22 = vrot.slane %v457_v21, 4  ;;  %v453_v23 = vpop.permute.xlu0 %452 }
 0x494   :  { %v456_v24 = vmul.f32 %v453_v23, %v444_v20 }
 0x495   :  { %v459_v25 = vadd.f32 %v458_v22, %v457_v21 }
 0x496   :  { %v464_v26 = vsel %vm206_vm1, %v456_v24, 0.0 }
 0x497   :  { %v460_v27 = vrot.slane %v459_v25, 2  ;;  %v465_v28 = vrot.slane %v464_v26, 4  ;;  %v502_v44 = vpop.permute.xlu0 %501 }
 0x499   :  { %v461_v29 = vadd.f32 %v460_v27, %v459_v25  ;;  %v466_v30 = vadd.f32 %v465_v28, %v464_v26 }
 0x49b   :  { %v462_v31 = vrot.slane %v461_v29, 1  ;;  %v467_v32 = vrot.slane %v466_v30, 2 }
 0x49d   :  { %v463_v33 = vadd.f32 %v462_v31, %v461_v29  ;;  %v468_v34 = vadd.f32 %v467_v32, %v466_v30 }
 0x49f   :  { %v469_v35 = vrot.slane %v468_v34, 1  ;;  %v485_v36 = vpack.c.bf16 %v463_v33, %v463_v33  ;;  %v1100_v33 = vld [vmem:[#allocation13] sm:$0xff]  }
 0x4a1   :  { %v470_v37 = vadd.f32 %v469_v35, %v468_v34  ;;  %v489_v38 = vunpack.c.l.b16 %v485_v36  ;;  %v1101_v35 = vld [vmem:[#allocation13 + $0x8] sm:$0xff]   ;;  %v1102_v36 = vld [vmem:[#allocation16] sm:$0xff]  }
 0x4a3   :  { %v486_v3 = vpack.c.bf16 %v470_v37, %v470_v37 }
 0x4a5   :  { %v490_v39 = vunpack.c.l.b16 %v486_v3 }
 0x4a7   :  { %v491_v40 = vsel %vm384_vm2, %v490_v39, %v489_v38  ;;  %v1103_v38 = vld [vmem:[#allocation16 + $0x8] sm:$0xff]  }
 0x4a8   :  { %v492_v41 = vpack.c.b16 %v491_v40, %v491_v40 }
 0x4aa   :  { %493 = vrot.lane.b32.xlu1 %v492_v41, %s1428_s5 }
 0x4ae   :  { %609 = vrot.lane.b32.xlu1 %v483_v10, %s1414_s12 }
 0x4b2   :  { %636 = vrot.lane.b32.xlu1 %v631_v63, %s1414_s12 }
 0x51c   :  { %v494_v45 = vpop.permute.xlu1 %493 }
 0x51d   :  { %v498_v46 = vsel %vm495_vm4, %v484_v43, %v494_v45 }
 0x51e   :  { %v505_v47 = vsel %vm503_vm5, %v498_v46, %v502_v44  ;;  %v1105_v46 = vld [vmem:[#allocation16 + $0x18] sm:$0xff]  }
 0x51f   :  { %1026 = vmatmul.mubr.msk.bf16.vlgmr.msra.gmra.mrb[0].mxu0 %vm542_vm6, %v505_v47  ;;  %v964_v47 = vld [vmem:[#allocation14] ss:$0 sm:$0xff] }
 0x520   :  { %1057 = vmatprep.mubr.msk.bf16.mxu0 %vm1424_vm0, %v1423_v0  ;;  %v610_v7 = vpop.permute.xlu1 %609  ;;  %1050 = vmatpush3.bf16.msra.mxu0 %v1102_v36 }
 0x521   :  { %1051 = vmatprep.subr.bf16.mxu0 %v1423_v0 }
 0x524   :  { %v637_v14 = vpop.permute.xlu1 %636  ;;  %1052 = vmatpush3.bf16.msra.mxu0 %v1103_v38 }
 0x525   :  { %1053 = vmatprep.subr.bf16.mxu0 %v1423_v0 }
 0x528   :  { %1054 = vmatpush3.bf16.msra.mxu0 %v1104_v42 }
 0x529   :  { %1055 = vmatprep.subr.bf16.mxu0 %v1423_v0 }
 0x52c   :  { %1056 = vmatpush3.bf16.msra.mxu0 %v1105_v46 }
 0x5f2   :  { %v579_v49 = vpop.f32.mrb[0].mxu0 }
 0x5f3   :  { %v580_v50 = vadd.f32 %v949_v48, %v579_v49  ;;  %v1027_v51 = vpop.f32.mrb[1].mxu0 }
 0x5f4   :  { %v582_v52 = vpop.f32.mrb[2].mxu0 }
 0x5f5   :  { %592 = vrot.lane.b32.xlu0 %v580_v50, %s1414_s12  ;;  %v1028_v53 = vpop.f32.mrb[3].mxu0  ;;  %v956_v54 = vmul.f32 -1.442695, %v580_v50 }
 0x5f7   :  { %1117 = vpow2.f32 %v956_v54 }
 0x601   :  { %v1118_v55 = vpop.eup %1117 }
 0x602   :  { %v588_v56 = vadd.f32 1.0, %v1118_v55 }
 0x604   :  { %1119 = vrcp.f32 %v588_v56 }
 0x60e   :  { %v1120_v57 = vpop.eup %1119 }
 0x60f   :  { %v602_v8 = vsub.f32 1.0, %v1120_v57  ;;  %v612_v10 = vmul.f32 %v1120_v57, %v610_v7 }
 0x667   :  { %v593_v58 = vpop.permute.xlu0 %592 }
 0x668   :  { %v595_v59 = vmul.f32 %v1120_v57, %v593_v58 }
 0x66a   :  { %597 = vrot.lane.b32.xlu0 %v595_v59, %s1417_s1 }
 0x6dc   :  { %v598_v60 = vpop.permute.xlu0 %597 }
 0x6dd   :  { %v600_v61 = vadd.f32 %v598_v60, %v580_v50 }
 0x6df   :  { %1121 = vtanh.f32 %v600_v61 }
 0x6e9   :  { %v1122_v4 = vpop.eup %1121 }
 0x6ea   :  { %604 = vrot.lane.b32.xlu0 %v1122_v4, %s1429_s10 }
 0x75c   :  { %v605_v9 = vpop.permute.xlu0 %604 }
 0x75d   :  { %v607_v11 = vmul.f32 %v605_v9, %v602_v8 }
 0x75f   :  { %v613_v12 = vadd.f32 %v612_v10, %v607_v11 }
 0x761   :  { %v630_v13 = vpack.c.bf16 %v613_v12, %v613_v12 }
 0x763   :  { %633 = vrot.lane.b32.xlu0 %v630_v13, %s1429_s10 }
 0x7d5   :  { %v634_v15 = vpop.permute.xlu0 %633 }
 0x7d6   :  { %v640_v16 = vsel %vm206_vm1, %v634_v15, %v637_v14 }
 0x7d7   :  { %1038 = vmatmul.mubr.msk.bf16.vlgmr.msra.gmra.mrb[8].mxu1 %vm671_vm7, %v640_v16 }
 0x7d8   :  { %1045 = vmatprep.mubr.msk.bf16.mxu1 %vm1424_vm0, %v1423_v0  ;;  %1042 = vmatpush3.bf16.msra.mxu1 %v1100_v33 }
 0x7d9   :  { %1043 = vmatprep.subr.bf16.mxu1 %v1423_v0 }
 0x7dc   :  { %1044 = vmatpush3.bf16.msra.mxu1 %v1101_v35 }
 0x8aa   :  { %v708_v18 = vpop.f32.mrb[8].mxu1 }
 0x8ab   :  { %v709_v19 = vadd.f32 %v957_v17, %v708_v18  ;;  %v1039_v20 = vpop.f32.mrb[9].mxu1 }
 0x8ac   :  { %v711_v21 = vpop.f32.mrb[10].mxu1 }
 0x8ad   :  { %721 = vrot.lane.b32.xlu0 %v709_v19, %s1414_s12  ;;  %v1040_v22 = vpop.f32.mrb[11].mxu1  ;;  %v963_v23 = vmul.f32 -1.442695, %v709_v19 }
 0x8af   :  { %1123 = vpow2.f32 %v963_v23 }
 0x8b9   :  { %v1124_v24 = vpop.eup %1123 }
 0x8ba   :  { %v717_v25 = vadd.f32 1.0, %v1124_v24 }
 0x8bc   :  { %1125 = vrcp.f32 %v717_v25 }
 0x8c6   :  { %v1126_v26 = vpop.eup %1125 }
 0x8c7   :  { %v731_v37 = vsub.f32 1.0, %v1126_v26 }
 0x91f   :  { %v722_v27 = vpop.permute.xlu0 %721 }
 0x920   :  { %v724_v28 = vmul.f32 %v1126_v26, %v722_v27 }
 0x922   :  { %726 = vrot.lane.b32.xlu1 %v724_v28, %s1417_s1  ;;  %s1430_s1 = smov [#allocation20]  }
 0x923   :  { %s919_s9 = sshll.u32 %s1430_s1, 4  ;;  %s920_s9 = int_to_ptr.vmem [resolvable:$true] %s919_s9 }
 0x924   :  { %s1349_s19 = scalar_lea.vmem %s920_s9, 64  ;;  %p1354_p11 = scmp.lt.s32.totalorder %s920_s9, %s920_s9 }
 0x925   :  { %p1350_p10 = scmp.ne.s32.totalorder %s920_s9, %s1349_s19  ;;  %p1355_p12 = scmp.lt.s32.totalorder %s1349_s19, %s1349_s19 }
 0x926   :  { %738 = vrot.lane.b32.xlu1 %v629_v62, %s1414_s12 }
 0x927   :  { %p1356_p13 = por %p1355_p12, %p1354_p11 }
 0x929   :  { %p1357_p0 = pnand %p1356_p13, %p1350_p10 }
 0x92a   :  { %615 = vrot.lane.b32.xlu1 %v613_v12, %s1429_s10 }
 0x994   :  { %v727_v29 = vpop.permute.xlu1 %726 }
 0x995   :  { %v729_v30 = vadd.f32 %v727_v29, %v709_v19 }
 0x997   :  { %1127 = vtanh.f32 %v729_v30 }
 0x998   :  { %v739_v31 = vpop.permute.xlu1 %738 }
 0x999   :  { %v741_v39 = vmul.f32 %v1126_v26, %v739_v31 }
 0x99c   :  { %v616_v32 = vpop.permute.xlu1 %615 }
 0x99d   :  { %619 = vst.msk [vmem:[#allocation20] sm:$0x3] %vm618_vm8, %v616_v32 }
 0x9a1   :  { %v1128_v34 = vpop.eup %1127 }
 0x9a2   :  { %733 = vrot.lane.b32.xlu0 %v1128_v34, %s1429_s10 }
 0xa14   :  { %v734_v3 = vpop.permute.xlu0 %733 }
 0xa15   :  { %v736_v40 = vmul.f32 %v734_v3, %v731_v37 }
 0xa17   :  { %v742_v41 = vadd.f32 %v741_v39, %v736_v40 }
 0xa19   :  { %v749_v43 = vpack.c.bf16 %v742_v41, %v742_v41 }
 0xa1b   :  { %762 = vrot.lane.b32.xlu0 %v749_v43, %s1429_s10 }
 0xa1f   :  { %744 = vrot.lane.b32.xlu0 %v742_v41, %s1429_s10 }
 0xa8d   :  { %v763_v44 = vpop.permute.xlu0 %762 }
 0xa8e   :  { %1046 = vmatmul.mubr.msk.bf16.vlgmr.msra.gmra.mrb[12].mxu1 %vm206_vm1, %v763_v44 }
 0xa91   :  { %v745_v45 = vpop.permute.xlu0 %744 }
 0xa92   :  { %748 = vst.msk [vmem:[#allocation20 + $0x2] sm:$0x3] %vm618_vm8, %v745_v45 }
 0xb61   :  { %v813_v48 = vpop.f32.mrb[12].mxu1 }
 0xb62   :  { %v814_v49 = vadd.f32 %v964_v47, %v813_v48  ;;  %v1047_v50 = vpop.f32.mrb[13].mxu1 }
 0xb63   :  { %v816_v51 = vpop.f32.mrb[14].mxu1 }
 0xb64   :  { %v819_v52 = vpack.c.bf16 %v814_v49, %v814_v49  ;;  %v1048_v53 = vpop.f32.mrb[15].mxu1 }
 0xb66   :  { %1058 = vmatmul.mubr.msk.bf16.vlgmr.msra.gmra.mrb[4].mxu0 %vm671_vm7, %v819_v52 }
 0xb67   :  { %1360 = shalt.err (!%p1357_p0)
}
 0xb68   :  { %s1361_s7 = scalar_lea.hbm %s1801_s16, 64 }
 0xb69   :  { %p1362_p1 = scmp.ne.s32.totalorder %s1801_s16, %s1361_s7  ;;  %p1365_p2 = scmp.lt.u32.totalorder %s1361_s7, %s1801_s16 }
 0xb6b   :  { %p1367_p3 = pnand %p1365_p2, %p1362_p1 }
 0xb6d   :  { %1370 = shalt.err (!%p1367_p3)
}
 0xb6e   :  { %925 = dma.vmem_to_hbm [thread:$0]  %s920_s9, 64, %s1801_s16, [#allocation21], %s1414_s12, %s1414_s12, %s1415_s20   ;;  %v968_v0 = vld [vmem:[#allocation17] ss:$0 sm:$0xff] }
 0xb6f   :  { %s1431_s30 = smov [#allocation19]  }
 0xb70   :  { %s910_s0 = sshll.u32 %s1431_s30, 4  ;;  %s911_s0 = int_to_ptr.vmem [resolvable:$true] %s910_s0 }
 0xb71   :  { %s1371_s6 = scalar_lea.vmem %s911_s0, 16  ;;  %s1375_s22 = scalar_lea.vmem %s911_s0, 32 }
 0xb72   :  { %p1372_p4 = scmp.ne.s32.totalorder %s911_s0, %s1371_s6  ;;  %p1376_p5 = scmp.lt.s32.totalorder %s911_s0, %s911_s0 }
 0xb73   :  { %p1377_p6 = scmp.lt.s32.totalorder %s1375_s22, %s1371_s6 }
 0xb75   :  { %p1378_p7 = por %p1377_p6, %p1376_p5 }
 0xb77   :  { %p1379_p8 = pnand %p1378_p7, %p1372_p4 }
 0xc39   :  { %v896_v54 = vpop.f32.mrb[4].mxu0 }
 0xc3a   :  { %v897_v55 = vadd.f32 %v968_v0, %v896_v54  ;;  %v1059_v56 = vpop.f32.mrb[5].mxu0 }
 0xc3b   :  { %v899_v57 = vpop.f32.mrb[6].mxu0 }
 0xc3c   :  { %v902_v58 = vpack.c.bf16 %v897_v55, %v897_v55  ;;  %v1060_v59 = vpop.f32.mrb[7].mxu0 }
 0xc3e   :  { %903 = vst [vmem:[#allocation19] sm:$0x1] %v902_v58 }
 0xc3f   :  { %1382 = shalt.err (!%p1379_p8)
}
 0xc40   :  { %s1383_s20 = scalar_lea.hbm %s1800_s15, 16 }
 0xc41   :  { %p1384_p9 = scmp.ne.s32.totalorder %s1800_s15, %s1383_s20  ;;  %p1387_p10 = scmp.lt.u32.totalorder %s1383_s20, %s1800_s15 }
 0xc43   :  { %p1389_p11 = pnand %p1387_p10, %p1384_p9 }
 0xc45   :  { %1392 = shalt.err (!%p1389_p11)
}
 0xc46   :  { %913 = dma.vmem_to_hbm [thread:$0]  %s911_s0, 16, %s1800_s15, [#allocation4]  }
 0xc47   :  { %1405 = dma.done.wait [#allocation4], 16  }
 0xc48   :  { %1406 = vsyncadd [#allocation4], 4294967280 }
 0xc49   :  { %1407 = dma.done.wait [#allocation21], 64  }
 0xc4a   :  { %1408 = vsyncadd [#allocation21], 4294967232 }
 0xc4b   :  { %932 = vsyncpa [#allocation3], 1 }
 0xc4c   :  { %933 = vsyncpa [#allocation6], 1 }
 0xc4d   :  { %934 = vsyncpa [#allocation9], 1 }
 0xc4e   :  { %935 = vsyncpa [#allocation12], 1 }
 0xc4f   :  { %936 = vsyncpa [#allocation15], 1 }
 0xc50   :  { %937 = vsyncpa [#allocation18], 1 }
 0xc51   :  { %938 = vsyncpa [#allocation4], 1 }
 0xc52   :  { %939 = vsyncpa [#allocation21], 1 }

</bundles_post_ra>
